<compile_context>
chip_gen: v6e
topology: v6e:2x2x1
jax: 0.10.0
libtpu: 0.0.40
codegen_flags: <defaults>
</compile_context>

<pallas_src>
import functools
from types import SimpleNamespace
from typing import List

import jax
import jax.numpy as jnp
from jax.experimental import pallas as pl
from jax.experimental.pallas import tpu as pltpu


FEAT_DIM = 32           # hidden width of the synthetic DMC surrogate
_STAT_PAD = (8, 128)    # lane-aligned padding for per-anchor scalar outputs


# --------------------------------------------------------------------------- #
# Pallas kernel: one (anchor, pixel-tile) step of the DMC surrogate
# --------------------------------------------------------------------------- #
def _dmc_frame_kernel(mvq_ref, yq_ref,                       # scalar prefetch (SMEM, (N,))
                      x_ref, r_ref,                          # (C, T) frame tiles
                      w1x_ref, w1r_ref, w2_ref, w3_ref,      # small weights (resident)
                      recon_ref,                             # (C, T) output tile
                      mse_ref, bppy_ref, bppmv_ref,          # (8, 128) per-anchor stats
                      acc_mse, acc_y, acc_mv,                # (1, T) f32 accumulators
                      *, inv_chw, inv_fhw):
    a = pl.program_id(0)          # anchor index
    t = pl.program_id(1)          # pixel tile index

    @pl.when(t == 0)
    def _():
        acc_mse[...] = jnp.zeros_like(acc_mse)
        acc_y[...] = jnp.zeros_like(acc_y)
        acc_mv[...] = jnp.zeros_like(acc_mv)

    x = x_ref[...]                # (C, T)
    r = r_ref[...]                # (C, T)

    # "motion/context encoder": 1x1 conv over concat(x, ref) == two matmuls
    feat = jnp.dot(w1x_ref[...], x, preferred_element_type=jnp.float32)
    feat = feat + jnp.dot(w1r_ref[...], r, preferred_element_type=jnp.float32)
    feat = jnp.maximum(feat, 0.0)                            # (F, T)

    mv_y = feat * mvq_ref[a]                                 # quant surrogate (scalar bcast)
    y = jnp.dot(w2_ref[...], mv_y, preferred_element_type=jnp.float32)
    y = jnp.maximum(y, 0.0) * yq_ref[a]                      # contextual latent (F, T)

    res = jnp.dot(w3_ref[...], y, preferred_element_type=jnp.float32)   # (C, T)
    recon = jnp.clip(r + res, 0.0, 1.0)
    recon_ref[...] = recon

    # Per-anchor partial sums (sublane reductions only; lane reduce at finalize).
    err = (x - recon) * (x - recon)
    acc_mse[...] += jnp.sum(err, axis=0, keepdims=True)
    acc_y[...] += jnp.sum(jnp.abs(y), axis=0, keepdims=True)
    acc_mv[...] += jnp.sum(jnp.abs(mv_y), axis=0, keepdims=True)

    @pl.when(t == pl.num_programs(1) - 1)
    def _():
        mse_v = jnp.sum(acc_mse[...], axis=1, keepdims=True) * inv_chw       # (1, 1)
        bppy_v = jnp.sum(acc_y[...], axis=1, keepdims=True) * inv_fhw
        bppmv_v = jnp.sum(acc_mv[...], axis=1, keepdims=True) * inv_fhw
        mse_ref[...] = jnp.broadcast_to(mse_v, _STAT_PAD)
        bppy_ref[...] = jnp.broadcast_to(bppy_v, _STAT_PAD)
        bppmv_ref[...] = jnp.broadcast_to(bppmv_v, _STAT_PAD)


def _pick_pixel_tile(hw):
    for t in (2048, 1024, 512, 256, 128):
        if hw % t == 0:
            return t
    return hw   # full-extent block is always legal


def dmc_frame_call(x3, r3, mvq, yq, w1x_t, w1r_t, w2_t, w3_t):
    """x3, r3: (N, C, HW) channel-major frames.  mvq, yq: (N,) scalars."""
    n, c, hw = x3.shape
    f = w1x_t.shape[0]
    t_pix = _pick_pixel_tile(hw)
    n_tiles = hw // t_pix

    kern = functools.partial(_dmc_frame_kernel,
                             inv_chw=1.0 / float(c * hw),
                             inv_fhw=1.0 / float(f * hw))

    frame_spec_in = pl.BlockSpec((None, c, t_pix), lambda a, t, *_: (a, 0, t))
    frame_spec_out = pl.BlockSpec((None, c, t_pix), lambda a, t, *_: (a, 0, t))
    stat_spec = pl.BlockSpec((None,) + _STAT_PAD, lambda a, t, *_: (a, 0, 0))

    grid_spec = pltpu.PrefetchScalarGridSpec(
        num_scalar_prefetch=2,
        grid=(n, n_tiles),
        in_specs=[
            frame_spec_in,                                            # x
            frame_spec_in,                                            # ref
            pl.BlockSpec((f, c), lambda a, t, *_: (0, 0)),            # w1x_t
            pl.BlockSpec((f, c), lambda a, t, *_: (0, 0)),            # w1r_t
            pl.BlockSpec((f, f), lambda a, t, *_: (0, 0)),            # w2_t
            pl.BlockSpec((c, f), lambda a, t, *_: (0, 0)),            # w3_t
        ],
        out_specs=[frame_spec_out, stat_spec, stat_spec, stat_spec],
        scratch_shapes=[pltpu.VMEM((1, t_pix), jnp.float32),
                        pltpu.VMEM((1, t_pix), jnp.float32),
                        pltpu.VMEM((1, t_pix), jnp.float32)],
    )

    out_shape = (
        jax.ShapeDtypeStruct((n, c, hw), jnp.float32),                # recon
        jax.ShapeDtypeStruct((n,) + _STAT_PAD, jnp.float32),          # mse (padded)
        jax.ShapeDtypeStruct((n,) + _STAT_PAD, jnp.float32),          # bpp_y (padded)
        jax.ShapeDtypeStruct((n,) + _STAT_PAD, jnp.float32),          # bpp_mv_y (padded)
    )

    flops = int(2 * n * hw * (2 * c * f + f * f + f * c))
    bytes_accessed = int(4 * n * c * hw * 3 + 4 * (2 * f * c + f * f + c * f))

    recon3, mse_p, bppy_p, bppmv_p = pl.pallas_call(
        kern,
        grid_spec=grid_spec,
        out_shape=out_shape,
        compiler_params=pltpu.CompilerParams(
            dimension_semantics=("parallel", "arbitrary")),
        cost_estimate=pl.CostEstimate(flops=flops, transcendentals=0,
                                      bytes_accessed=bytes_accessed),
    )(mvq, yq, x3, r3, w1x_t, w1r_t, w2_t, w3_t)

    return recon3, mse_p[:, 0, 0], bppy_p[:, 0, 0], bppmv_p[:, 0, 0]


@jax.jit
def _dmc_forward_jit(x_nchw, ref_nchw, mvq, yq, w1x_t, w1r_t, w2_t, w3_t):
    n, c, h, w = x_nchw.shape
    hw = h * w
    recon3, mse, bpp_y, bpp_mv = dmc_frame_call(
        x_nchw.reshape(n, c, hw), ref_nchw.reshape(n, c, hw),
        mvq, yq, w1x_t, w1r_t, w2_t, w3_t)
    return recon3.reshape(n, c, h, w), mse, bpp_y, bpp_mv


@jax.jit
def _combine_loss(rate, dist, p_dist, lambdas, dist_lambda, pl_lambda):
    loss = rate + lambdas * (dist * dist_lambda + p_dist * pl_lambda)
    return loss, jnp.mean(loss)


# --------------------------------------------------------------------------- #
# Synthetic DMC (stand-in for core.model DMC)
# --------------------------------------------------------------------------- #
class DMCSurrogate:
    """Deterministic tiny stand-in for DMC exposing forward_one_frame()."""
    # TODO(synk): real DMC (optic flow, mv/ctx encoders, hyper priors, entropy
    # models) is a large external network not included in the reference file.

    def __init__(self, anchor_num, channels=3, feat=FEAT_DIM):
        k1, k2, k3, k4 = jax.random.split(jax.random.PRNGKey(42), 4)
        # weights stored transposed for the channel-major (C, HW) layout
        self.w1x_t = jax.random.normal(k1, (feat, channels), jnp.float32) * 0.2
        self.w1r_t = jax.random.normal(k2, (feat, channels), jnp.float32) * 0.2
        self.w2_t = jax.random.normal(k3, (feat, feat), jnp.float32) * 0.1
        self.w3_t = jax.random.normal(k4, (channels, feat), jnp.float32) * 0.1
        # per-anchor global quant scales (learned params in the real model)
        self.mv_y_q_scale = jnp.linspace(0.5, 1.25, anchor_num, dtype=jnp.float32)
        self.y_q_scale = jnp.linspace(0.6, 1.5, anchor_num, dtype=jnp.float32)
        self.anchor_num = anchor_num
        self.channels = channels

    def forward_one_frame(self, x_nchw, dpb, mv_y_q_scale, y_q_scale):
        n = x_nchw.shape[0]
        ref_nchw = dpb['ref_frame']
        mvq = jnp.broadcast_to(jnp.asarray(mv_y_q_scale, jnp.float32).reshape(-1), (n,))
        yq = jnp.broadcast_to(jnp.asarray(y_q_scale, jnp.float32).reshape(-1), (n,))
        recon, mse, bpp_y, bpp_mv = _dmc_forward_jit(
            x_nchw, ref_nchw, mvq, yq,
            self.w1x_t, self.w1r_t, self.w2_t, self.w3_t)
        return {
            'dpb': {'ref_frame': recon, 'ref_feature': None,
                    'ref_y': None, 'ref_mv_y': None},
            'mse': mse,
            'bpp_y': bpp_y,
            'bpp_mv_y': bpp_mv,
            'bpp': bpp_y + bpp_mv,
        }


def _detach_dpb(dpb):
    return {k: (jax.lax.stop_gradient(v) if v is not None else None)
            for k, v in dpb.items()}


# --------------------------------------------------------------------------- #
# DCVC_HEM (JAX / Pallas)
# --------------------------------------------------------------------------- #
class DCVC_HEM_Pallas:
    def __init__(self, cfg, channels=3):
        self.cfg = cfg
        self.lambdas = jnp.asarray(cfg.SOLVER.LAMBDAS, jnp.float32)
        self.pl_lambda = float(cfg.SOLVER.PL_LAMBDA)
        self.dist_lambda = float(cfg.SOLVER.DIST_LAMBDA)
        self.dmc = DMCSurrogate(anchor_num=len(cfg.SOLVER.LAMBDAS), channels=channels)
        # TODO(synk): perceptual-loss CNNs (FasterRCNN/FPN/YOLO) and the
        # requires_grad "activate_modules_*" toggles have no Pallas equivalent.

    # ------------------------------------------------------------------ #
    def _frame_loss(self, output, loss_dist_key, loss_rate_keys, lambdas,
                    perceptual_loss):
        rate = jnp.zeros_like(self.lambdas)
        for key in loss_rate_keys:
            assert key in output
            rate = rate + output[key]
        assert loss_dist_key in output
        dist = output[loss_dist_key]
        # perceptual_loss network not available -> zeros (matches disabled path)
        perceptual_dist = jnp.zeros_like(self.lambdas)
        loss, loss_mean = _combine_loss(rate, dist, perceptual_dist, lambdas,
                                        self.dist_lambda, self.pl_lambda)
        return rate, dist, perceptual_dist, loss, loss_mean

    # ------------------------------------------------------------------ #
    def forward_single(self, input, target, optimizer, loss_dist_key,
                       loss_rate_keys: List[str], p_frames, perceptual_loss,
                       is_train=True, i_frame_net=None, i_frame_q_scales=None):
        # TODO(synk): optimizer.zero_grad/backward/step and i_frame_net have no
        # in-kernel equivalent; only the eval (is_train=False) path is supported.
        assert not is_train and optimizer is None and i_frame_net is None
        n, t, c, h, w = input.shape
        assert 0 < p_frames < t
        assert self.lambdas.shape[0] == n
        result = {'rate': [], 'dist': [], 'p_dist': [], 'loss': [], 'loss_seq': [],
                  'input_seqs': [], 'decod_seqs': [], 'single_forwards': 0}
        lambdas = self.lambdas if len(loss_rate_keys) else jnp.ones_like(self.lambdas)
        for t_i in range(0, t - p_frames):
            dpb = {'ref_frame': input[:, t_i], 'ref_feature': None,
                   'ref_y': None, 'ref_mv_y': None}
            input_seqs = [target[:, t_i]]
            decod_seqs = [input[:, t_i]]
            loss_list = []
            for p_idx in range(0, p_frames):
                output = self.dmc.forward_one_frame(
                    input[:, t_i + 1 + p_idx], dpb,
                    self.dmc.mv_y_q_scale, self.dmc.y_q_scale)
                dpb = _detach_dpb(output['dpb'])
                rate, dist, p_dist, loss, _ = self._frame_loss(
                    output, loss_dist_key, loss_rate_keys, lambdas, perceptual_loss)
                loss_list.append(loss)
                result['rate'].append(rate)
                result['dist'].append(dist)
                result['p_dist'].append(p_dist)
                result['loss'].append(loss)
                result['single_forwards'] += 1
                input_seqs.append(target[:, t_i + 1 + p_idx])
                decod_seqs.append(dpb['ref_frame'])
            loss_seq = jnp.mean(jnp.stack(loss_list, -1), -1)
            result['loss_seq'].append(loss_seq)
            result['input_seqs'].append(jnp.stack(input_seqs, -1))
            result['decod_seqs'].append(jnp.stack(decod_seqs, -1))
        result['rate'] = jnp.stack(result['rate'], -1)
        result['dist'] = jnp.stack(result['dist'], -1)
        result['p_dist'] = jnp.stack(result['p_dist'], -1)
        result['loss'] = jnp.stack(result['loss'], -1)
        result['loss_seq'] = jnp.stack(result['loss_seq'], -1)
        result['input_seqs'] = jnp.transpose(jnp.stack(result['input_seqs'], -1),
                                             (0, 5, 4, 1, 2, 3))
        result['decod_seqs'] = jnp.transpose(jnp.stack(result['decod_seqs'], -1),
                                             (0, 5, 4, 1, 2, 3))
        return result

    # ------------------------------------------------------------------ #
    def forward_single_multi(self, input, target, loss_dist_key,
                             loss_rate_keys: List[str], dpb, perceptual_loss):
        n, c, h, w = input.shape
        assert self.lambdas.shape[0] == n
        lambdas = self.lambdas if len(loss_rate_keys) else jnp.ones_like(self.lambdas)
        output = self.dmc.forward_one_frame(input, dpb, self.dmc.mv_y_q_scale,
                                            self.dmc.y_q_scale)
        dpb = _detach_dpb(output['dpb'])
        rate, dist, p_dist, loss, loss_to_opt = self._frame_loss(
            output, loss_dist_key, loss_rate_keys, lambdas, perceptual_loss)
        return {'rate': rate, 'dist': dist, 'p_dist': p_dist, 'loss': loss,
                'loss_to_opt': loss_to_opt, 'input_seqs': target,
                'decod_seqs': dpb['ref_frame'], 'dpb': dpb}

    # ------------------------------------------------------------------ #
    def forward_cascade_multi(self, input, target, loss_dist_key,
                              loss_rate_keys: List[str], dpb, p_frames, t_i,
                              perceptual_loss):
        n, t, c, h, w = input.shape
        assert self.lambdas.shape[0] == n
        lambdas = self.lambdas if len(loss_rate_keys) else jnp.ones_like(self.lambdas)
        input_seqs = [target[:, t_i]]
        decod_seqs = [input[:, t_i]]
        rate_list, dist_list, p_dist_list, loss_list = [], [], [], []
        for p_idx in range(0, p_frames):
            output = self.dmc.forward_one_frame(
                input[:, t_i + 1 + p_idx], dpb,
                self.dmc.mv_y_q_scale, self.dmc.y_q_scale)
            dpb = output['dpb']
            rate, dist, p_dist, loss, _ = self._frame_loss(
                output, loss_dist_key, loss_rate_keys, lambdas, perceptual_loss)
            rate_list.append(rate)
            dist_list.append(dist)
            p_dist_list.append(p_dist)
            loss_list.append(loss)
            input_seqs.append(target[:, t_i + 1 + p_idx])
            decod_seqs.append(dpb['ref_frame'])
        rate = jnp.mean(jnp.stack(rate_list, -1), -1)
        dist = jnp.mean(jnp.stack(dist_list, -1), -1)
        p_dist = jnp.mean(jnp.stack(p_dist_list, -1), -1)
        loss = jnp.mean(jnp.stack(loss_list, -1), -1)
        loss_to_opt = jnp.mean(loss, -1)
        return {'rate': rate, 'dist': dist, 'p_dist': p_dist, 'loss': loss,
                'loss_to_opt': loss_to_opt,
                'input_seqs': jnp.stack(input_seqs, -1),
                'decod_seqs': jnp.stack(decod_seqs, -1),
                'dpb': dpb}

    # ------------------------------------------------------------------ #
    def forward_simple(self, input, dpb):
        n, t, c, h, w = input.shape
        assert self.lambdas.shape[0] == n
        out_dpb = []
        for i in range(n):
            output = self.dmc.forward_one_frame(input[i], dpb[i],
                                                self.dmc.mv_y_q_scale[i],
                                                self.dmc.y_q_scale[i])
            out_dpb.append(output['dpb'])
        return out_dpb

    # ------------------------------------------------------------------ #
    def forward(self, forward_method: str, input, target=None, loss_dist_key=None,
                loss_rate_keys=None, p_frames=None, perceptual_loss=None,
                optimizer=None, is_train=True, dpb=None, t_i=None,
                i_frame_net=None, i_frame_q_scales=None):
        if forward_method == 'single':
            return self.forward_single(input, target, optimizer, loss_dist_key,
                                       loss_rate_keys, p_frames, perceptual_loss,
                                       is_train, i_frame_net, i_frame_q_scales)
        elif forward_method == 'single_multi':
            return self.forward_single_multi(input, target, loss_dist_key,
                                             loss_rate_keys, dpb, perceptual_loss)
        elif forward_method == 'cascade_multi':
            return self.forward_cascade_multi(input, target, loss_dist_key,
                                              loss_rate_keys, dpb, p_frames, t_i,
                                              perceptual_loss)
        elif forward_method == 'forward_simple':
            return self.forward_simple(input, dpb)
        else:
            # TODO(synk): 'cascade' training path needs optimizer backward/step.
            raise NotImplementedError(forward_method)


# --------------------------------------------------------------------------- #
if __name__ == "__main__":
    cfg = SimpleNamespace(SOLVER=SimpleNamespace(
        LAMBDAS=[85.0, 170.0, 380.0, 840.0],
        PL_LAMBDA=0.5,
        DIST_LAMBDA=1.0,
        PL_MODEL='resnet',
        PL_LAYERS=[0, 1],
    ))

    N, T, C, H, W = 4, 4, 3, 16, 16  # N == len(LAMBDAS)
    key = jax.random.PRNGKey(0)
    k1, k2 = jax.random.split(key)
    inp = jax.random.uniform(k1, (N, T, C, H, W), jnp.float32)
    tgt = jax.random.uniform(k2, (N, T, C, H, W), jnp.float32)

    model = DCVC_HEM_Pallas(cfg, channels=C)

    # cascade_multi
    dpb = {'ref_frame': inp[:, 0], 'ref_feature': None, 'ref_y': None, 'ref_mv_y': None}
    out_cm = model.forward('cascade_multi', inp, target=tgt, loss_dist_key='mse',
                           loss_rate_keys=['bpp_y', 'bpp_mv_y'], dpb=dpb,
                           p_frames=2, t_i=0, perceptual_loss=False)
    jax.block_until_ready(out_cm['loss'])
    jax.block_until_ready(out_cm['dpb']['ref_frame'])

    # single_multi
    dpb2 = {'ref_frame': inp[:, 0], 'ref_feature': None, 'ref_y': None, 'ref_mv_y': None}
    out_sm = model.forward('single_multi', inp[:, 1], target=tgt[:, 1],
                           loss_dist_key='mse', loss_rate_keys=['bpp'], dpb=dpb2,
                           perceptual_loss=False)
    jax.block_until_ready(out_sm['loss'])

    # single (eval)
    out_s = model.forward('single', inp, target=tgt, loss_dist_key='mse',
                          loss_rate_keys=['bpp_y', 'bpp_mv_y'], p_frames=2,
                          perceptual_loss=False, is_train=False)
    jax.block_until_ready(out_s['loss'])

    assert out_cm['loss'].shape == (N,)
    assert out_cm['dpb']['ref_frame'].shape == (N, C, H, W)
    assert out_sm['loss'].shape == (N,)
    assert out_s['loss'].shape == (N, 2 * (T - 2))
    assert out_s['decod_seqs'].shape == (N, T - 2, 3, C, H, W)
    print("KERNEL_OK")
</pallas_src>

<mosaic_0001>
module attributes {stable_mosaic.version = 11 : i64} {
  func.func @_dmc_frame_kernel(%arg0: i32, %arg1: i32, %arg2: memref<4xf32, #tpu.memory_space<smem>>, %arg3: memref<4xf32, #tpu.memory_space<smem>>, %arg4: memref<1x3x256xf32, #tpu.memory_space<vmem>>, %arg5: memref<1x3x256xf32, #tpu.memory_space<vmem>>, %arg6: memref<32x3xf32, #tpu.memory_space<vmem>>, %arg7: memref<32x3xf32, #tpu.memory_space<vmem>>, %arg8: memref<32x32xf32, #tpu.memory_space<vmem>>, %arg9: memref<3x32xf32, #tpu.memory_space<vmem>>, %arg10: memref<1x3x256xf32, #tpu.memory_space<vmem>>, %arg11: memref<1x8x128xf32, #tpu.memory_space<vmem>>, %arg12: memref<1x8x128xf32, #tpu.memory_space<vmem>>, %arg13: memref<1x8x128xf32, #tpu.memory_space<vmem>>, %arg14: memref<1x256xf32, #tpu.memory_space<vmem>>, %arg15: memref<1x256xf32, #tpu.memory_space<vmem>>, %arg16: memref<1x256xf32, #tpu.memory_space<vmem>>) attributes {dimension_semantics = [#tpu.dimension_semantics<parallel>, #tpu.dimension_semantics<arbitrary>], iteration_bounds = array<i64: 4, 1>, scalar_prefetch = 2 : i64, scratch_operands = 3 : i64, tpu.core_type = #tpu.core_type<tc>, window_params = [{transform_indices = @transform_0, window_bounds = array<i64: 1, 3, 256>}, {transform_indices = @transform_1, window_bounds = array<i64: 1, 3, 256>}, {pipeline_mode = #tpu.pipeline_mode<synchronous>, transform_indices = @transform_2, window_bounds = array<i64: 32, 3>}, {pipeline_mode = #tpu.pipeline_mode<synchronous>, transform_indices = @transform_3, window_bounds = array<i64: 32, 3>}, {pipeline_mode = #tpu.pipeline_mode<synchronous>, transform_indices = @transform_4, window_bounds = array<i64: 32, 32>}, {pipeline_mode = #tpu.pipeline_mode<synchronous>, transform_indices = @transform_5, window_bounds = array<i64: 3, 32>}, {transform_indices = @transform_6, window_bounds = array<i64: 1, 3, 256>}, {transform_indices = @transform_7, window_bounds = array<i64: 1, 8, 128>}, {transform_indices = @transform_8, window_bounds = array<i64: 1, 8, 128>}, {transform_indices = @transform_9, window_bounds = array<i64: 1, 8, 128>}]} {
    %c0_i32 = arith.constant 0 : i32
    %0 = arith.cmpi eq, %arg1, %c0_i32 : i32
    %1 = arith.extui %0 : i1 to i32
    %c0_i32_0 = arith.constant 0 : i32
    %2 = arith.cmpi ne, %1, %c0_i32_0 : i32
    scf.if %2 {
      %cst_41 = arith.constant 0.000000e+00 : f32
      %59 = vector.broadcast %cst_41 : f32 to vector<1x256xf32>
      %c0_42 = arith.constant 0 : index
      %c0_43 = arith.constant 0 : index
      %60 = vector.load %arg14[%c0_42, %c0_43] : memref<1x256xf32, #tpu.memory_space<vmem>>, vector<1x256xf32>
      tpu.vector_store %arg14[%c0_42, %c0_43], %59 {strides = array<i32>} : memref<1x256xf32, #tpu.memory_space<vmem>>, vector<1x256xf32>,
      %cst_44 = arith.constant 0.000000e+00 : f32
      %61 = vector.broadcast %cst_44 : f32 to vector<1x256xf32>
      %c0_45 = arith.constant 0 : index
      %c0_46 = arith.constant 0 : index
      %62 = vector.load %arg15[%c0_45, %c0_46] : memref<1x256xf32, #tpu.memory_space<vmem>>, vector<1x256xf32>
      tpu.vector_store %arg15[%c0_45, %c0_46], %61 {strides = array<i32>} : memref<1x256xf32, #tpu.memory_space<vmem>>, vector<1x256xf32>,
      %cst_47 = arith.constant 0.000000e+00 : f32
      %63 = vector.broadcast %cst_47 : f32 to vector<1x256xf32>
      %c0_48 = arith.constant 0 : index
      %c0_49 = arith.constant 0 : index
      %64 = vector.load %arg16[%c0_48, %c0_49] : memref<1x256xf32, #tpu.memory_space<vmem>>, vector<1x256xf32>
      tpu.vector_store %arg16[%c0_48, %c0_49], %63 {strides = array<i32>} : memref<1x256xf32, #tpu.memory_space<vmem>>, vector<1x256xf32>,
    } else {
    }
    %c0 = arith.constant 0 : index
    %c0_1 = arith.constant 0 : index
    %c0_2 = arith.constant 0 : index
    %3 = vector.load %arg4[%c0, %c0_1, %c0_2] : memref<1x3x256xf32, #tpu.memory_space<vmem>>, vector<1x3x256xf32>
    %4 = vector.shape_cast %3 : vector<1x3x256xf32> to vector<3x256xf32>
    %c0_3 = arith.constant 0 : index
    %c0_4 = arith.constant 0 : index
    %c0_5 = arith.constant 0 : index
    %5 = vector.load %arg5[%c0_3, %c0_4, %c0_5] : memref<1x3x256xf32, #tpu.memory_space<vmem>>, vector<1x3x256xf32>
    %6 = vector.shape_cast %5 : vector<1x3x256xf32> to vector<3x256xf32>
    %c0_6 = arith.constant 0 : index
    %c0_7 = arith.constant 0 : index
    %7 = vector.load %arg6[%c0_6, %c0_7] : memref<32x3xf32, #tpu.memory_space<vmem>>, vector<32x3xf32>
    %cst = arith.constant dense<0.000000e+00> : vector<32x256xf32>
    %8 = tpu.matmul %7, %4, %cst {dimension_numbers = #tpu.dot_dimension_numbers<[1], [0], [0], [1], [0, 0, 1, 1], [], []>} : vector<32x3xf32>, vector<3x256xf32>, vector<32x256xf32> -> vector<32x256xf32>
    %c0_8 = arith.constant 0 : index
    %c0_9 = arith.constant 0 : index
    %9 = vector.load %arg7[%c0_8, %c0_9] : memref<32x3xf32, #tpu.memory_space<vmem>>, vector<32x3xf32>
    %cst_10 = arith.constant dense<0.000000e+00> : vector<32x256xf32>
    %10 = tpu.matmul %9, %6, %cst_10 {dimension_numbers = #tpu.dot_dimension_numbers<[1], [0], [0], [1], [0, 0, 1, 1], [], []>} : vector<32x3xf32>, vector<3x256xf32>, vector<32x256xf32> -> vector<32x256xf32>
    %11 = arith.addf %8, %10 : vector<32x256xf32>
    %cst_11 = arith.constant 0.000000e+00 : f32
    %12 = vector.broadcast %cst_11 : f32 to vector<32x256xf32>
    %13 = arith.maximumf %11, %12 : vector<32x256xf32>
    %14 = arith.index_cast %arg0 : i32 to index
    %15 = memref.load %arg2[%14] : memref<4xf32, #tpu.memory_space<smem>>
    %16 = vector.broadcast %15 : f32 to vector<32x256xf32>
    %17 = arith.mulf %13, %16 : vector<32x256xf32>
    %c0_12 = arith.constant 0 : index
    %c0_13 = arith.constant 0 : index
    %18 = vector.load %arg8[%c0_12, %c0_13] : memref<32x32xf32, #tpu.memory_space<vmem>>, vector<32x32xf32>
    %cst_14 = arith.constant dense<0.000000e+00> : vector<32x256xf32>
    %19 = tpu.matmul %18, %17, %cst_14 {dimension_numbers = #tpu.dot_dimension_numbers<[1], [0], [0], [1], [0, 0, 1, 1], [], []>} : vector<32x32xf32>, vector<32x256xf32>, vector<32x256xf32> -> vector<32x256xf32>
    %cst_15 = arith.constant 0.000000e+00 : f32
    %20 = vector.broadcast %cst_15 : f32 to vector<32x256xf32>
    %21 = arith.maximumf %19, %20 : vector<32x256xf32>
    %22 = arith.index_cast %arg0 : i32 to index
    %23 = memref.load %arg3[%22] : memref<4xf32, #tpu.memory_space<smem>>
    %24 = vector.broadcast %23 : f32 to vector<32x256xf32>
    %25 = arith.mulf %21, %24 : vector<32x256xf32>
    %c0_16 = arith.constant 0 : index
    %c0_17 = arith.constant 0 : index
    %26 = vector.load %arg9[%c0_16, %c0_17] : memref<3x32xf32, #tpu.memory_space<vmem>>, vector<3x32xf32>
    %cst_18 = arith.constant dense<0.000000e+00> : vector<3x256xf32>
    %27 = tpu.matmul %26, %25, %cst_18 {dimension_numbers = #tpu.dot_dimension_numbers<[1], [0], [0], [1], [0, 0, 1, 1], [], []>} : vector<3x32xf32>, vector<32x256xf32>, vector<3x256xf32> -> vector<3x256xf32>
    %28 = arith.addf %6, %27 : vector<3x256xf32>
    %cst_19 = arith.constant 0.000000e+00 : f32
    %cst_20 = arith.constant 1.000000e+00 : f32
    %29 = vector.broadcast %cst_19 : f32 to vector<3x256xf32>
    %30 = arith.maximumf %29, %28 : vector<3x256xf32>
    %31 = vector.broadcast %cst_20 : f32 to vector<3x256xf32>
    %32 = arith.minimumf %31, %30 : vector<3x256xf32>
    %c0_21 = arith.constant 0 : index
    %c0_22 = arith.constant 0 : index
    %c0_23 = arith.constant 0 : index
    %33 = vector.load %arg10[%c0_21, %c0_22, %c0_23] : memref<1x3x256xf32, #tpu.memory_space<vmem>>, vector<1x3x256xf32>
    %34 = vector.shape_cast %33 : vector<1x3x256xf32> to vector<3x256xf32>
    %35 = vector.shape_cast %32 : vector<3x256xf32> to vector<1x3x256xf32>
    tpu.vector_store %arg10[%c0_21, %c0_22, %c0_23], %35 {strides = array<i32>} : memref<1x3x256xf32, #tpu.memory_space<vmem>>, vector<1x3x256xf32>,
    %36 = arith.subf %4, %32 : vector<3x256xf32>
    %37 = arith.subf %4, %32 : vector<3x256xf32>
    %38 = arith.mulf %36, %37 : vector<3x256xf32>
    %c0_24 = arith.constant 0 : index
    %c0_25 = arith.constant 0 : index
    %39 = vector.load %arg14[%c0_24, %c0_25] : memref<1x256xf32, #tpu.memory_space<vmem>>, vector<1x256xf32>
    %cst_26 = arith.constant dense<0.000000e+00> : vector<256xf32>
    %40 = vector.multi_reduction <add>, %38, %cst_26 [0] : vector<3x256xf32> to vector<256xf32>
    %41 = vector.shape_cast %40 : vector<256xf32> to vector<1x256xf32>
    %42 = arith.addf %39, %41 : vector<1x256xf32>
    %c0_27 = arith.constant 0 : index
    %c0_28 = arith.constant 0 : index
    %43 = vector.load %arg14[%c0_27, %c0_28] : memref<1x256xf32, #tpu.memory_space<vmem>>, vector<1x256xf32>
    tpu.vector_store %arg14[%c0_27, %c0_28], %42 {strides = array<i32>} : memref<1x256xf32, #tpu.memory_space<vmem>>, vector<1x256xf32>,
    %c0_29 = arith.constant 0 : index
    %c0_30 = arith.constant 0 : index
    %44 = vector.load %arg15[%c0_29, %c0_30] : memref<1x256xf32, #tpu.memory_space<vmem>>, vector<1x256xf32>
    %45 = math.absf %25 : vector<32x256xf32>
    %cst_31 = arith.constant dense<0.000000e+00> : vector<256xf32>
    %46 = vector.multi_reduction <add>, %45, %cst_31 [0] : vector<32x256xf32> to vector<256xf32>
    %47 = vector.shape_cast %46 : vector<256xf32> to vector<1x256xf32>
    %48 = arith.addf %44, %47 : vector<1x256xf32>
    %c0_32 = arith.constant 0 : index
    %c0_33 = arith.constant 0 : index
    %49 = vector.load %arg15[%c0_32, %c0_33] : memref<1x256xf32, #tpu.memory_space<vmem>>, vector<1x256xf32>
    tpu.vector_store %arg15[%c0_32, %c0_33], %48 {strides = array<i32>} : memref<1x256xf32, #tpu.memory_space<vmem>>, vector<1x256xf32>,
    %c0_34 = arith.constant 0 : index
    %c0_35 = arith.constant 0 : index
    %50 = vector.load %arg16[%c0_34, %c0_35] : memref<1x256xf32, #tpu.memory_space<vmem>>, vector<1x256xf32>
    %51 = math.absf %17 : vector<32x256xf32>
    %cst_36 = arith.constant dense<0.000000e+00> : vector<256xf32>
    %52 = vector.multi_reduction <add>, %51, %cst_36 [0] : vector<32x256xf32> to vector<256xf32>
    %53 = vector.shape_cast %52 : vector<256xf32> to vector<1x256xf32>
    %54 = arith.addf %50, %53 : vector<1x256xf32>
    %c0_37 = arith.constant 0 : index
    %c0_38 = arith.constant 0 : index
    %55 = vector.load %arg16[%c0_37, %c0_38] : memref<1x256xf32, #tpu.memory_space<vmem>>, vector<1x256xf32>
    tpu.vector_store %arg16[%c0_37, %c0_38], %54 {strides = array<i32>} : memref<1x256xf32, #tpu.memory_space<vmem>>, vector<1x256xf32>,
    %c0_i32_39 = arith.constant 0 : i32
    %56 = arith.cmpi eq, %arg1, %c0_i32_39 : i32
    %57 = arith.extui %56 : i1 to i32
    %c0_i32_40 = arith.constant 0 : i32
    %58 = arith.cmpi ne, %57, %c0_i32_40 : i32
    scf.if %58 {
      %c0_41 = arith.constant 0 : index
      %c0_42 = arith.constant 0 : index
      %59 = vector.load %arg14[%c0_41, %c0_42] : memref<1x256xf32, #tpu.memory_space<vmem>>, vector<1x256xf32>
      %cst_43 = arith.constant dense<0.000000e+00> : vector<1xf32>
      %60 = vector.multi_reduction <add>, %59, %cst_43 [1] : vector<1x256xf32> to vector<1xf32>
      %61 = vector.shape_cast %60 : vector<1xf32> to vector<1x1xf32>
      %cst_44 = arith.constant 0.00130208337 : f32
      %62 = vector.broadcast %cst_44 : f32 to vector<1x1xf32>
      %63 = arith.mulf %61, %62 : vector<1x1xf32>
      %c0_45 = arith.constant 0 : index
      %c0_46 = arith.constant 0 : index
      %64 = vector.load %arg15[%c0_45, %c0_46] : memref<1x256xf32, #tpu.memory_space<vmem>>, vector<1x256xf32>
      %cst_47 = arith.constant dense<0.000000e+00> : vector<1xf32>
      %65 = vector.multi_reduction <add>, %64, %cst_47 [1] : vector<1x256xf32> to vector<1xf32>
      %66 = vector.shape_cast %65 : vector<1xf32> to vector<1x1xf32>
      %cst_48 = arith.constant 1.22070313E-4 : f32
      %67 = vector.broadcast %cst_48 : f32 to vector<1x1xf32>
      %68 = arith.mulf %66, %67 : vector<1x1xf32>
      %c0_49 = arith.constant 0 : index
      %c0_50 = arith.constant 0 : index
      %69 = vector.load %arg16[%c0_49, %c0_50] : memref<1x256xf32, #tpu.memory_space<vmem>>, vector<1x256xf32>
      %cst_51 = arith.constant dense<0.000000e+00> : vector<1xf32>
      %70 = vector.multi_reduction <add>, %69, %cst_51 [1] : vector<1x256xf32> to vector<1xf32>
      %71 = vector.shape_cast %70 : vector<1xf32> to vector<1x1xf32>
      %cst_52 = arith.constant 1.22070313E-4 : f32
      %72 = vector.broadcast %cst_52 : f32 to vector<1x1xf32>
      %73 = arith.mulf %71, %72 : vector<1x1xf32>
      %74 = vector.shape_cast %63 : vector<1x1xf32> to vector<1x1xf32>
      %75 = vector.broadcast %74 : vector<1x1xf32> to vector<8x128xf32>
      %c0_53 = arith.constant 0 : index
      %c0_54 = arith.constant 0 : index
      %c0_55 = arith.constant 0 : index
      %76 = vector.load %arg11[%c0_53, %c0_54, %c0_55] : memref<1x8x128xf32, #tpu.memory_space<vmem>>, vector<1x8x128xf32>
      %77 = vector.shape_cast %76 : vector<1x8x128xf32> to vector<8x128xf32>
      %78 = vector.shape_cast %75 : vector<8x128xf32> to vector<1x8x128xf32>
      tpu.vector_store %arg11[%c0_53, %c0_54, %c0_55], %78 {strides = array<i32>} : memref<1x8x128xf32, #tpu.memory_space<vmem>>, vector<1x8x128xf32>,
      %79 = vector.shape_cast %68 : vector<1x1xf32> to vector<1x1xf32>
      %80 = vector.broadcast %79 : vector<1x1xf32> to vector<8x128xf32>
      %c0_56 = arith.constant 0 : index
      %c0_57 = arith.constant 0 : index
      %c0_58 = arith.constant 0 : index
      %81 = vector.load %arg12[%c0_56, %c0_57, %c0_58] : memref<1x8x128xf32, #tpu.memory_space<vmem>>, vector<1x8x128xf32>
      %82 = vector.shape_cast %81 : vector<1x8x128xf32> to vector<8x128xf32>
      %83 = vector.shape_cast %80 : vector<8x128xf32> to vector<1x8x128xf32>
      tpu.vector_store %arg12[%c0_56, %c0_57, %c0_58], %83 {strides = array<i32>} : memref<1x8x128xf32, #tpu.memory_space<vmem>>, vector<1x8x128xf32>,
      %84 = vector.shape_cast %73 : vector<1x1xf32> to vector<1x1xf32>
      %85 = vector.broadcast %84 : vector<1x1xf32> to vector<8x128xf32>
      %c0_59 = arith.constant 0 : index
      %c0_60 = arith.constant 0 : index
      %c0_61 = arith.constant 0 : index
      %86 = vector.load %arg13[%c0_59, %c0_60, %c0_61] : memref<1x8x128xf32, #tpu.memory_space<vmem>>, vector<1x8x128xf32>
      %87 = vector.shape_cast %86 : vector<1x8x128xf32> to vector<8x128xf32>
      %88 = vector.shape_cast %85 : vector<8x128xf32> to vector<1x8x128xf32>
      tpu.vector_store %arg13[%c0_59, %c0_60, %c0_61], %88 {strides = array<i32>} : memref<1x8x128xf32, #tpu.memory_space<vmem>>, vector<1x8x128xf32>,
    } else {
    }
    return
  }
  func.func @transform_0(%arg0: i32, %arg1: i32, %arg2: memref<4xf32, #tpu.memory_space<smem>>, %arg3: memref<4xf32, #tpu.memory_space<smem>>) -> (i32, i32, i32) {
    %c0_i32 = arith.constant 0 : i32
    %c0_i32_0 = arith.constant 0 : i32
    return %arg0, %c0_i32, %arg1 : i32, i32, i32
  }
  func.func @transform_1(%arg0: i32, %arg1: i32, %arg2: memref<4xf32, #tpu.memory_space<smem>>, %arg3: memref<4xf32, #tpu.memory_space<smem>>) -> (i32, i32, i32) {
    %c0_i32 = arith.constant 0 : i32
    %c0_i32_0 = arith.constant 0 : i32
    return %arg0, %c0_i32, %arg1 : i32, i32, i32
  }
  func.func @transform_2(%arg0: i32, %arg1: i32, %arg2: memref<4xf32, #tpu.memory_space<smem>>, %arg3: memref<4xf32, #tpu.memory_space<smem>>) -> (i32, i32) {
    %c0_i32 = arith.constant 0 : i32
    %c0_i32_0 = arith.constant 0 : i32
    %c0_i32_1 = arith.constant 0 : i32
    return %c0_i32, %c0_i32_0 : i32, i32
  }
  func.func @transform_3(%arg0: i32, %arg1: i32, %arg2: memref<4xf32, #tpu.memory_space<smem>>, %arg3: memref<4xf32, #tpu.memory_space<smem>>) -> (i32, i32) {
    %c0_i32 = arith.constant 0 : i32
    %c0_i32_0 = arith.constant 0 : i32
    %c0_i32_1 = arith.constant 0 : i32
    return %c0_i32, %c0_i32_0 : i32, i32
  }
  func.func @transform_4(%arg0: i32, %arg1: i32, %arg2: memref<4xf32, #tpu.memory_space<smem>>, %arg3: memref<4xf32, #tpu.memory_space<smem>>) -> (i32, i32) {
    %c0_i32 = arith.constant 0 : i32
    %c0_i32_0 = arith.constant 0 : i32
    %c0_i32_1 = arith.constant 0 : i32
    return %c0_i32, %c0_i32_0 : i32, i32
  }
  func.func @transform_5(%arg0: i32, %arg1: i32, %arg2: memref<4xf32, #tpu.memory_space<smem>>, %arg3: memref<4xf32, #tpu.memory_space<smem>>) -> (i32, i32) {
    %c0_i32 = arith.constant 0 : i32
    %c0_i32_0 = arith.constant 0 : i32
    %c0_i32_1 = arith.constant 0 : i32
    return %c0_i32, %c0_i32_0 : i32, i32
  }
  func.func @transform_6(%arg0: i32, %arg1: i32, %arg2: memref<4xf32, #tpu.memory_space<smem>>, %arg3: memref<4xf32, #tpu.memory_space<smem>>) -> (i32, i32, i32) {
    %c0_i32 = arith.constant 0 : i32
    %c0_i32_0 = arith.constant 0 : i32
    return %arg0, %c0_i32, %arg1 : i32, i32, i32
  }
  func.func @transform_7(%arg0: i32, %arg1: i32, %arg2: memref<4xf32, #tpu.memory_space<smem>>, %arg3: memref<4xf32, #tpu.memory_space<smem>>) -> (i32, i32, i32) {
    %c0_i32 = arith.constant 0 : i32
    %c0_i32_0 = arith.constant 0 : i32
    %c0_i32_1 = arith.constant 0 : i32
    return %arg0, %c0_i32, %c0_i32_0 : i32, i32, i32
  }
  func.func @transform_8(%arg0: i32, %arg1: i32, %arg2: memref<4xf32, #tpu.memory_space<smem>>, %arg3: memref<4xf32, #tpu.memory_space<smem>>) -> (i32, i32, i32) {
    %c0_i32 = arith.constant 0 : i32
    %c0_i32_0 = arith.constant 0 : i32
    %c0_i32_1 = arith.constant 0 : i32
    return %arg0, %c0_i32, %c0_i32_0 : i32, i32, i32
  }
  func.func @transform_9(%arg0: i32, %arg1: i32, %arg2: memref<4xf32, #tpu.memory_space<smem>>, %arg3: memref<4xf32, #tpu.memory_space<smem>>) -> (i32, i32, i32) {
    %c0_i32 = arith.constant 0 : i32
    %c0_i32_0 = arith.constant 0 : i32
    %c0_i32_1 = arith.constant 0 : i32
    return %arg0, %c0_i32, %c0_i32_0 : i32, i32, i32
  }
}

</mosaic_0001>

<bundles_post_ra>
// kernel: _dmc_forward_jit.1
= control target key start
LH: loop header
LB: loop body
LE: loop exit
PB: predicated region body
PF: predicated region fallthrough
CT: control target
= control target key end

     0   :  { %s1703_s0 = inlined_call_operand.vmem [shape: f32[4], index: 0, kind: input, shape index: {}]   ;;  %s1704_s2 = inlined_call_operand.vmem [shape: f32[4,3,256], index: 2, kind: input, shape index: {}]   ;;  %s1705_s3 = inlined_call_operand.vmem [shape: f32[4,3,256], index: 3, kind: input, shape index: {}]   ;;  %s1706_s4 = inlined_call_operand.vmem [shape: f32[32,3], index: 4, kind: input, shape index: {}]   ;;  %s1707_s5 = inlined_call_operand.vmem [shape: f32[32,3], index: 5, kind: input, shape index: {}]   ;;  %s1708_s6 = inlined_call_operand.vmem [shape: f32[32,32], index: 6, kind: input, shape index: {}]   ;;  %s1709_s7 = inlined_call_operand.vmem [shape: f32[3,32], index: 7, kind: input, shape index: {}]   ;;  %s1710_s8 = inlined_call_operand.vmem [shape: f32[4,3,256], index: 8, kind: output, shape index: {0}]   ;;  %s1711_s9 = inlined_call_operand.vmem [shape: f32[4,8,128], index: 9, kind: output, shape index: {1}]   ;;  %s1712_s10 = inlined_call_operand.vmem [shape: f32[4,8,128], index: 10, kind: output, shape index: {2}]   ;;  %s1713_s11 = inlined_call_operand.vmem [shape: f32[4,8,128], index: 11, kind: output, shape index: {3}]   ;;  %s1714_s1 = inlined_call_operand.vmem [shape: f32[4], index: 1, kind: input, shape index: {}]  }
   0x1   :  { %s17_s19 = sshll.u32 %s1703_s0, 4  ;;  %s21_s22 = sshll.u32 %s1714_s1, 4  ;;  %s18_s19 = int_to_ptr.vmem [resolvable:$true] %s17_s19  ;;  %s22_s22 = int_to_ptr.vmem [resolvable:$true] %s21_s22 }
   0x2   :  { %s1390_s23 = scalar_lea.vmem %s18_s19, 16  ;;  %p1395_p1 = scmp.lt.s32.totalorder %s18_s19, %s18_s19 }
   0x3   :  { %p1391_p0 = scmp.ne.s32.totalorder %s18_s19, %s1390_s23  ;;  %p1396_p2 = scmp.lt.s32.totalorder %s1390_s23, %s1390_s23 }
   0x5   :  { %p1397_p3 = por %p1396_p2, %p1395_p1 }
   0x7   :  { %p1398_p4 = pnand %p1397_p3, %p1391_p0 }
   0x9   :  { %1401 = shalt.err (!%p1398_p4)  }
   0xa   :  { %s1440_s24 = smov [#allocation6]   ;;  %s1402_s25 = scalar_lea.vmem %s22_s22, 16 }
   0xb   :  { %20 = dma.vmem_to_smem %s18_s19, 16, %s1440_s24, [#allocation5] }
   0xc   :  { %p1403_p5 = scmp.ne.s32.totalorder %s22_s22, %s1402_s25  ;;  %p1407_p6 = scmp.lt.s32.totalorder %s22_s22, %s22_s22 }
   0xd   :  { %p1408_p7 = scmp.lt.s32.totalorder %s1402_s25, %s1402_s25 }
   0xf   :  { %p1409_p8 = por %p1408_p7, %p1407_p6 }
  0x11   :  { %p1410_p9 = pnand %p1409_p8, %p1403_p5 }
  0x13   :  { %1413 = shalt.err (!%p1410_p9)  }
  0x14   :  { %s1441_s0 = smov [#allocation7]  }
  0x15   :  { %24 = dma.vmem_to_smem %s22_s22, 16, %s1441_s0, [#allocation5] }
  0x16   :  { %1426 = dma.done.wait [#allocation5], 32 }
  0x17   :  { %1427 = vsyncadd [#allocation5], 4294967264 }
  0x18   :  { %26 = sfence }
  0x19   :  { %s1510_s1 = smov 0   ;;  %s1512_s26 = smov 0  }
  0x1a   :  { %s1514_s27 = smov 0  }
  0x1b LB: > { %s44_s28 = sadd.s32 1, %s1434_s26  ;;  %p1326_p10 = scmp.ge.s32.totalorder %s1438_s27, 1  ;;  %s1438_s27 = sphi %s1514_s27, %s32_s27   ;;  %s1434_s26 = sphi %s1512_s26, %s1718_s26   ;;  %s1430_s1 = sphi %s1510_s1, %s1717_s1  }
  0x1c   : > { %p46_p11 = scmp.ge.s32.totalorder %s44_s28, 4  ;;  %p344_p12 = scmp.lt.s32.totalorder %s1438_s27, 5 }
  0x1e   : > { %s1720_s28 = smov (%p46_p11, %s44_s28), 0  ;;  %p345_p13 = pnand %p1326_p10, %p344_p12 }
  0x1f   : > { %p410_p0 = scmp.lt.s32.totalorder (!%p345_p13), %s1430_s1, 3  ;;  %s696_s18 = sld [smem:[#allocation6 + %s1430_s1]] (!%p345_p13) }
  0x20   : > { %348 = sbr.rel (%p345_p13) target bundleno = 884 (0x374), region = 44 }
  0x25   : > { %v1442_v0 = vmov 0.0   ;;  %s411_s29 = scalar_select %p410_p0, %s1430_s1, 3  ;;  %vm487_vm0 = vcmask 1042432   ;;  %v470_v5 = vld [vmem:[%s1707_s5 + $0x10] sm:$0xff]  ;;  %vm474_vm1 = vcmask 23552   ;;  %v468_v6 = vld [vmem:[%s1707_s5] sm:$0xff]  ;;  %v455_v13 = vlaneseq }
  0x26   : > { %568 = vmatprep.mubr.f32.mxu1 %v1442_v0  ;;  %556 = vmatprep.mubr.f32.mxu0 %v1442_v0  ;;  %v471_v7 = vld [vmem:[%s1707_s5 + $0x18] sm:$0xff]  ;;  %v469_v8 = vld [vmem:[%s1707_s5 + $0x8] sm:$0xff]  ;;  %v464_v9 = vld [vmem:[%s1706_s4] sm:$0xff]  ;;  %v697_v34 = vstv %s696_s18  ;;  %vm710_vm3 = vcmask 261120   ;;  %vm1066_vm4 = vcmask 1040384  }
  0x27   : > { %s1534_s30 = sshll.u32 %s411_s29, 3  ;;  %v465_v10 = vld [vmem:[%s1706_s4 + $0x8] sm:$0xff]  ;;  %v466_v11 = vld [vmem:[%s1706_s4 + $0x10] sm:$0xff]  ;;  %v467_v12 = vld [vmem:[%s1706_s4 + $0x18] sm:$0xff]  ;;  %vm1602_vm2 = vcmp.lt.s32.totalorder %v455_v13, 256 }
  0x28   : > { %s427_s14 = scalar_lea.vmem %s1705_s3, %s1534_s30  ;;  %s417_s17 = scalar_lea.vmem %s1704_s2, %s1534_s30  ;;  %459 = vst.msk [vmem:[#allocation2] sm:$0x3] %vm1602_vm2, %v1442_v0  ;;  %460 = vst.msk [vmem:[#allocation3] sm:$0x3] %vm1602_vm2, %v1442_v0 }
  0x29   : > { %v1544_v1 = vld [vmem:[%s427_s14] sm:$0x77]  ;;  %461 = vst.msk [vmem:[#allocation4] sm:$0x3] %vm1602_vm2, %v1442_v0  ;;  %s450_s13 = scalar_lea.vmem %s1713_s11, %s1534_s30  ;;  %s820_s14 = sld [smem:[#allocation7 + %s1430_s1]] }
  0x2a   : > { %v1546_v2 = vld [vmem:[%s417_s17] sm:$0x77]  ;;  %v473_v3 = vcombine.high %v1544_v1, %v1544_v1  ;;  %s437_s18 = scalar_lea.vmem %s1710_s8, %s1534_s30  ;;  %s442_s21 = scalar_lea.vmem %s1711_s9, %s1534_s30 }
  0x2b   : > { %v582_v4 = vcombine.high %v1546_v2, %v1546_v2  ;;  %s446_s24 = scalar_lea.vmem %s1712_s10, %s1534_s30 }
  0x2c   : > { %1358 = vmatprep.subr.msk.mxu1 %vm487_vm0, %v473_v3  ;;  %1336 = vmatprep.subr.msk.mxu0 %vm487_vm0, %v473_v3 }
  0x2d   : > { %1359 = vmatpush1.msk.msra.mxu1 %vm487_vm0, %v1544_v1  ;;  %1337 = vmatpush1.msk.msra.mxu0 %vm487_vm0, %v1544_v1 }
  0x2e   : > { %1340 = vmatmul.mubr.msk.f32.vlgmr.msra.gmra.mxu1 %vm474_vm1, %v470_v5  ;;  %1342 = vmatprep.subr.msk.mxu1 %vm487_vm0, %v582_v4 }
  0x2f   : > { %574 = vmatprep.mubr.f32.mxu1 %v1442_v0  ;;  %1343 = vmatpush1.msk.msra.mxu1 %vm487_vm0, %v1546_v2 }
  0x30   : > { %1338 = vmatmul.mubr.msk.f32.vlgmr.msra.gmra.mxu0 %vm474_vm1, %v468_v6 }
  0x31   : > { %562 = vmatprep.mubr.f32.mxu0 %v1442_v0 }
  0x32   : > { %1341 = vmatmul.mubr.msk.f32.gmra.mxu1 %vm474_vm1, %v471_v7 }
  0x33   : > { %663 = vmatprep.mubr.f32.mxu1 %v1442_v0 }
  0x34   : > { %1339 = vmatmul.mubr.msk.f32.gmra.mxu0 %vm474_vm1, %v469_v8 }
  0x35   : > { %787 = vmatprep.mubr.f32.mxu0 %v1442_v0 }
  0x36   : > { %1344 = vmatmul.mubr.msk.f32.vlgmr.msra.gmra.mxu1 %vm474_vm1, %v464_v9 }
  0x37   : > { %669 = vmatprep.mubr.f32.mxu1 %v1442_v0 }
  0x3a   : > { %1345 = vmatmul.mubr.msk.f32.gmra.mxu1 %vm474_vm1, %v465_v10 }
  0x3b   : > { %675 = vmatprep.mubr.f32.mxu1 %v1442_v0 }
  0x3e   : > { %1346 = vmatmul.mubr.msk.f32.gmra.mxu1 %vm474_vm1, %v466_v11 }
  0x3f   : > { %681 = vmatprep.mubr.f32.mxu1 %v1442_v0 }
  0x42   : > { %1347 = vmatmul.mubr.msk.f32.gmra.mxu1 %vm474_vm1, %v467_v12  ;;  %v706_v12 = vld [vmem:[%s1708_s6] sm:$0xff] }
  0x43   : > { %898 = vmatprep.mubr.f32.mxu1 %v1442_v0 }
  0xee   : > { %v570_v15 = vpop.f32.mrf.mxu1 }
  0xf0   : > { %v572_v16 = vpop.f32.mrf.mxu1  ;;  %v558_v17 = vpop.f32.mrf.mxu0 }
  0xf2   : > { %v576_v18 = vpop.f32.mrf.mxu1  ;;  %v560_v19 = vpop.f32.mrf.mxu0 }
  0xf4   : > { %v578_v20 = vpop.f32.mrf.mxu1  ;;  %v564_v22 = vpop.f32.mrf.mxu0 }
  0xf6   : > { %v665_v21 = vpop.f32.mrf.mxu1  ;;  %v566_v26 = vpop.f32.mrf.mxu0 }
  0xf7   : > { %v666_v24 = vadd.f32 %v665_v21, %v558_v17  ;;  %v707_v21 = vld [vmem:[%s1708_s6 + $0x8] sm:$0xff] }
  0xf8   : > { %v667_v23 = vpop.f32.mrf.mxu1 }
  0xf9   : > { %v668_v27 = vadd.f32 %v667_v23, %v560_v19  ;;  %v688_v32 = vmax.f32 %v666_v24, 0.0  ;;  %v940_v24 = vshrl.u32 %v455_v13, 7  ;;  %v709_v13 = vld [vmem:[%s1708_s6 + $0x18] sm:$0xff] }
  0xfa   : > { %v671_v25 = vpop.f32.mrf.mxu1 }
  0xfb   : > { %v672_v28 = vadd.f32 %v671_v25, %v564_v22  ;;  %v689_v35 = vmax.f32 %v668_v27, 0.0  ;;  %v698_v43 = vmul.f32 %v697_v34, %v688_v32  ;;  %v708_v27 = vld [vmem:[%s1708_s6 + $0x10] sm:$0xff] }
  0xfc   : > { %v673_v29 = vpop.f32.mrf.mxu1 }
  0xfd   : > { %v690_v30 = vmax.f32 %v672_v28, 0.0  ;;  %v674_v31 = vadd.f32 %v673_v29, %v566_v26  ;;  %v699_v45 = vmul.f32 %v697_v34, %v689_v35  ;;  %v1005_v54 = vand.u32 2147483647, %v698_v43 }
  0xfe   : > { %v677_v33 = vpop.f32.mrf.mxu1 }
  0xff   : > { %v691_v36 = vmax.f32 %v674_v31, 0.0  ;;  %v678_v37 = vadd.f32 %v677_v33, %v570_v15  ;;  %v700_v38 = vmul.f32 %v697_v34, %v690_v30  ;;  %v1006_v57 = vand.u32 2147483647, %v699_v45  ;;  %v1004_v33 = vld [vmem:[#allocation4] sm:$0x3] }
 0x100   : > { %v679_v39 = vpop.f32.mrf.mxu1 }
 0x101   : > { %v701_v40 = vmul.f32 %v697_v34, %v691_v36  ;;  %v692_v41 = vmax.f32 %v678_v37, 0.0  ;;  %v680_v42 = vadd.f32 %v679_v39, %v572_v16  ;;  %v1007_v48 = vand.u32 2147483647, %v700_v38 }
 0x102   : > { %v683_v44 = vpop.f32.mrf.mxu1  ;;  %v1443_v16 = vmov 1966171168   ;;  %v1642_v36 = vsub.s32 0, %v940_v24 }
 0x103   : > { %v702_v46 = vmul.f32 %v697_v34, %v692_v41  ;;  %v693_v47 = vmax.f32 %v680_v42, 0.0  ;;  %v684_v49 = vadd.f32 %v683_v44, %v576_v18  ;;  %v1008_v51 = vand.u32 2147483647, %v701_v40 }
 0x104   : > { %v685_v50 = vpop.f32.mrf.mxu1  ;;  %v1013_v60 = vadd.f32 %v1007_v48, %v1005_v54  ;;  %v937_v17 = vunpack.c.l.s4 %v1443_v16 }
 0x105   : > { %v703_v52 = vmul.f32 %v697_v34, %v693_v47  ;;  %v686_v53 = vadd.f32 %v685_v50, %v578_v20  ;;  %v1009_v55 = vand.u32 2147483647, %v702_v46  ;;  %v694_v56 = vmax.f32 %v684_v49, 0.0 }
 0x106   : > { %v1022_v62 = vadd.f32 %v1008_v51, %v1006_v57  ;;  %v938_v23 = vunpack.c.0.s8 %v937_v17  ;;  %v821_v50 = vstv %s820_s14 }
 0x107   : > { %v1010_v58 = vand.u32 2147483647, %v703_v52  ;;  %v695_v59 = vmax.f32 %v686_v53, 0.0  ;;  %v704_v61 = vmul.f32 %v697_v34, %v694_v56  ;;  %v1014_v3 = vadd.f32 %v1013_v60, %v1009_v55 }
 0x108   : > { %v1630_v30 = vsub.s32 %v938_v23, %v940_v24 }
 0x109   : > { %v705_v63 = vmul.f32 %v697_v34, %v695_v59  ;;  %v1011_v4 = vand.u32 2147483647, %v704_v61  ;;  %v1023_v5 = vadd.f32 %v1022_v62, %v1010_v58 }
 0x10b   : > { %v1012_v6 = vand.u32 2147483647, %v705_v63  ;;  %747 = vmatprep.subr.mxu0 %v705_v63  ;;  %v1015_v7 = vadd.f32 %v1014_v3, %v1011_v4 }
 0x10c   : > { %748 = vmatpush1.msra.mxu0 %v704_v61 }
 0x10d   : > { %v1024_v8 = vadd.f32 %v1023_v5, %v1012_v6  ;;  %749 = vmatprep.subr.mxu0 %v703_v52  ;;  %v1016_v9 = vrot.slane %v1015_v7, 4 }
 0x10e   : > { %750 = vmatpush1.msra.mxu0 %v702_v46 }
 0x10f   : > { %v1025_v10 = vrot.slane %v1024_v8, 4  ;;  %751 = vmatprep.subr.mxu0 %v701_v40  ;;  %v1017_v11 = vadd.f32 %v1016_v9, %v1015_v7 }
 0x110   : > { %752 = vmatpush1.msra.mxu0 %v700_v38 }
 0x111   : > { %v1026_v15 = vadd.f32 %v1025_v10, %v1024_v8  ;;  %753 = vmatprep.subr.mxu0 %v699_v45  ;;  %v1018_v18 = vrot.slane %v1017_v11, 2 }
 0x112   : > { %754 = vmatpush1.msra.mxu0 %v698_v43 }
 0x113   : > { %v1027_v19 = vrot.slane %v1026_v15, 2  ;;  %1348 = vmatmul.mubr.msk.f32.vlgmr.msra.gmra.mxu0 %vm710_vm3, %v706_v12  ;;  %v1019_v20 = vadd.f32 %v1018_v18, %v1017_v11 }
 0x114   : > { %793 = vmatprep.mubr.f32.mxu0 %v1442_v0 }
 0x115   : > { %v1028_v22 = vadd.f32 %v1027_v19, %v1026_v15  ;;  %v1020_v25 = vrot.slane %v1019_v20, 1 }
 0x117   : > { %v1029_v26 = vrot.slane %v1028_v22, 1  ;;  %1349 = vmatmul.mubr.msk.f32.gmra.mxu0 %vm710_vm3, %v707_v21  ;;  %v1021_v28 = vadd.f32 %v1020_v25, %v1019_v20 }
 0x118   : > { %799 = vmatprep.mubr.f32.mxu0 %v1442_v0 }
 0x119   : > { %v1030_v29 = vadd.f32 %v1029_v26, %v1028_v22 }
 0x11b   : > { %v1033_v31 = vcombine.low %v1021_v28, %v1030_v29  ;;  %1350 = vmatmul.mubr.msk.f32.gmra.mxu0 %vm710_vm3, %v708_v27  ;;  %v830_v29 = vld [vmem:[%s1709_s7] sm:$0x7] }
 0x11c   : > { %805 = vmatprep.mubr.f32.mxu0 %v1442_v0  ;;  %v1644_v0 = vsub.s32 1, %v940_v24 }
 0x11d   : > { %v1040_v32 = vrot.slane %v1033_v31, %v1630_v30 }
 0x11f   : > { %1351 = vmatmul.mubr.msk.f32.gmra.mxu0 %vm710_vm3, %v709_v13  ;;  %v1047_v34 = vrot.slane %v1040_v32, %v1630_v30 }
 0x121   : > { %v1049_v35 = vadd.f32 %v1047_v34, %v1004_v33 }
 0x123   : > { %1050 = vst.msk [vmem:[#allocation4] sm:$0x3] %vm1602_vm2, %v1049_v35 }
 0x12a   : > { %v1091_v37 = vld [vmem:[#allocation4] sm:$0x3] }
 0x12b   : > { %v1096_v38 = vrot.slane %v1091_v37, %v1642_v36  ;;  %v1100_v39 = vrot.slane %v1091_v37, %v1644_v0 }
 0x12d   : > { %v1103_v40 = vsel %vm1066_vm4, %v1096_v38, 0.0  ;;  %v1104_v41 = vsel %vm1066_vm4, %v1100_v39, 0.0 }
 0x12e   : > { %v1105_v42 = vadd.f32 %v1104_v41, %v1103_v40 }
 0x130   : > { %1106 = vadd.xlane.f32.xlu1 %v1105_v42  ;;  %v957_v42 = vld [vmem:[#allocation3] sm:$0x3] }
 0x1b9   : > { %v1107_v43 = vpop.xlane.xlu1 %1106 }
 0x1ba   : > { %v1108_v44 = vmul.f32 0.00012207031, %v1107_v43 }
 0x1bc   : > { %v1122_v45 = vrot.slane %v1108_v44, %v1642_v36 }
 0x1be   : > { %1123 = vst [vmem:[%s450_s13] sm:$0xff] %v1122_v45 }
 0x1d3   : > { %v789_v46 = vpop.f32.mrf.mxu0 }
 0x1d4   : > { %v812_v48 = vmax.f32 %v789_v46, 0.0 }
 0x1d5   : > { %v791_v47 = vpop.f32.mrf.mxu0 }
 0x1d6   : > { %v813_v52 = vmax.f32 %v791_v47, 0.0  ;;  %v822_v56 = vmul.f32 %v821_v50, %v812_v48 }
 0x1d7   : > { %v795_v49 = vpop.f32.mrf.mxu0 }
 0x1d8   : > { %v814_v51 = vmax.f32 %v795_v49, 0.0  ;;  %v823_v60 = vmul.f32 %v821_v50, %v813_v52  ;;  %v958_v4 = vand.u32 2147483647, %v822_v56 }
 0x1d9   : > { %v797_v53 = vpop.f32.mrf.mxu0 }
 0x1da   : > { %v824_v54 = vmul.f32 %v821_v50, %v814_v51  ;;  %v815_v55 = vmax.f32 %v797_v53, 0.0  ;;  %v959_v10 = vand.u32 2147483647, %v823_v60 }
 0x1db   : > { %v801_v57 = vpop.f32.mrf.mxu0 }
 0x1dc   : > { %v825_v58 = vmul.f32 %v821_v50, %v815_v55  ;;  %v816_v59 = vmax.f32 %v801_v57, 0.0  ;;  %v960_v62 = vand.u32 2147483647, %v824_v54 }
 0x1dd   : > { %v803_v61 = vpop.f32.mrf.mxu0 }
 0x1de   : > { %v826_v63 = vmul.f32 %v821_v50, %v816_v59  ;;  %v817_v3 = vmax.f32 %v803_v61, 0.0  ;;  %v961_v6 = vand.u32 2147483647, %v825_v58  ;;  %v966_v12 = vadd.f32 %v960_v62, %v958_v4 }
 0x1df   : > { %v807_v5 = vpop.f32.mrf.mxu0 }
 0x1e0   : > { %v962_v7 = vand.u32 2147483647, %v826_v63  ;;  %v827_v8 = vmul.f32 %v821_v50, %v817_v3  ;;  %v818_v9 = vmax.f32 %v807_v5, 0.0  ;;  %v975_v18 = vadd.f32 %v961_v6, %v959_v10 }
 0x1e1   : > { %v809_v11 = vpop.f32.mrf.mxu0 }
 0x1e2   : > { %v963_v15 = vand.u32 2147483647, %v827_v8  ;;  %v828_v16 = vmul.f32 %v821_v50, %v818_v9  ;;  %v819_v17 = vmax.f32 %v809_v11, 0.0  ;;  %v967_v19 = vadd.f32 %v966_v12, %v962_v7  ;;  %v915_v7 = vld [vmem:[#allocation2] sm:$0x3] }
 0x1e4   : > { %v964_v20 = vand.u32 2147483647, %v828_v16  ;;  %v829_v21 = vmul.f32 %v821_v50, %v819_v17  ;;  %v976_v22 = vadd.f32 %v975_v18, %v963_v15 }
 0x1e6   : > { %v968_v23 = vadd.f32 %v967_v19, %v964_v20  ;;  %v965_v24 = vand.u32 2147483647, %v829_v21  ;;  %858 = vmatprep.subr.mxu1 %v829_v21 }
 0x1e7   : > { %859 = vmatpush1.msra.mxu1 %v828_v16 }
 0x1e8   : > { %v969_v25 = vrot.slane %v968_v23, 4  ;;  %v977_v26 = vadd.f32 %v976_v22, %v965_v24  ;;  %860 = vmatprep.subr.mxu1 %v827_v8 }
 0x1e9   : > { %861 = vmatpush1.msra.mxu1 %v826_v63 }
 0x1ea   : > { %v970_v27 = vadd.f32 %v969_v25, %v968_v23  ;;  %v978_v28 = vrot.slane %v977_v26, 4  ;;  %862 = vmatprep.subr.mxu1 %v825_v58 }
 0x1eb   : > { %863 = vmatpush1.msra.mxu1 %v824_v54 }
 0x1ec   : > { %v971_v31 = vrot.slane %v970_v27, 2  ;;  %v979_v13 = vadd.f32 %v978_v28, %v977_v26  ;;  %864 = vmatprep.subr.mxu1 %v823_v60 }
 0x1ed   : > { %865 = vmatpush1.msra.mxu1 %v822_v56 }
 0x1ee   : > { %v972_v32 = vadd.f32 %v971_v31, %v970_v27  ;;  %v980_v33 = vrot.slane %v979_v13, 2  ;;  %1352 = vmatmul.mubr.msk.f32.vlgmr.msra.gmra.mxu1 %vm710_vm3, %v830_v29 }
 0x1f0   : > { %v973_v34 = vrot.slane %v972_v32, 1  ;;  %v981_v35 = vadd.f32 %v980_v33, %v979_v13 }
 0x1f2   : > { %v982_v37 = vrot.slane %v981_v35, 1  ;;  %v974_v38 = vadd.f32 %v973_v34, %v972_v32 }
 0x1f4   : > { %v983_v39 = vadd.f32 %v982_v37, %v981_v35 }
 0x1f6   : > { %v986_v40 = vcombine.low %v974_v38, %v983_v39 }
 0x1f8   : > { %v993_v41 = vrot.slane %v986_v40, %v1630_v30 }
 0x1fa   : > { %v1000_v43 = vrot.slane %v993_v41, %v1630_v30 }
 0x1fc   : > { %v1002_v44 = vadd.f32 %v1000_v43, %v957_v42 }
 0x1fe   : > { %1003 = vst.msk [vmem:[#allocation3] sm:$0x3] %vm1602_vm2, %v1002_v44 }
 0x205   : > { %v1073_v10 = vld [vmem:[#allocation3] sm:$0x3] }
 0x206   : > { %v1078_v16 = vrot.slane %v1073_v10, %v1642_v36  ;;  %v1082_v17 = vrot.slane %v1073_v10, %v1644_v0 }
 0x208   : > { %v1085_v14 = vsel %vm1066_vm4, %v1078_v16, 0.0  ;;  %v1086_v20 = vsel %vm1066_vm4, %v1082_v17, 0.0 }
 0x209   : > { %v1087_v21 = vadd.f32 %v1086_v20, %v1085_v14 }
 0x2ae   : > { %v900_v45 = vpop.f32.mrf.mxu1 }
 0x2b0   : > { %v902_v46 = vpop.f32.mrf.mxu1 }
 0x2b1   : > { %v907_v47 = vcombine.low %v900_v45, %v902_v46 }
 0x2b3   : > { %v909_v48 = vadd.f32 %v907_v47, %v1544_v1 }
 0x2b5   : > { %v910_v49 = vmax.f32 %v909_v48, 0.0 }
 0x2b7   : > { %v911_v50 = vmin.f32 %v910_v49, 1.0 }
 0x2b9   : > { %912 = vst [vmem:[%s437_s18] sm:$0x77] %v911_v50  ;;  %v913_v51 = vsub.f32 %v1546_v2, %v911_v50 }
 0x2bb   : > { %v914_v52 = vmul.f32 %v913_v51, %v913_v51 }
 0x2bd   : > { %v917_v53 = vcombine.high %v914_v52, %v914_v52  ;;  %v919_v54 = vsel %vm487_vm0, %v914_v52, 0.0 }
 0x2be   : > { %v920_v55 = vrot.slane %v919_v54, 4 }
 0x2bf   : > { %v926_v56 = vsel %vm487_vm0, %v917_v53, 0.0 }
 0x2c0   : > { %v921_v57 = vadd.f32 %v920_v55, %v919_v54  ;;  %v927_v58 = vrot.slane %v926_v56, 4 }
 0x2c2   : > { %v922_v59 = vrot.slane %v921_v57, 2  ;;  %v928_v1 = vadd.f32 %v927_v58, %v926_v56 }
 0x2c4   : > { %v923_v60 = vadd.f32 %v922_v59, %v921_v57  ;;  %v929_v61 = vrot.slane %v928_v1, 2 }
 0x2c6   : > { %v924_v62 = vrot.slane %v923_v60, 1  ;;  %v930_v63 = vadd.f32 %v929_v61, %v928_v1 }
 0x2c8   : > { %v931_v3 = vrot.slane %v930_v63, 1  ;;  %v925_v4 = vadd.f32 %v924_v62, %v923_v60 }
 0x2ca   : > { %v932_v5 = vadd.f32 %v931_v3, %v930_v63 }
 0x2cc   : > { %v935_v6 = vcombine.low %v925_v4, %v932_v5 }
 0x2ce   : > { %v942_v2 = vrot.slane %v935_v6, %v1630_v30 }
 0x2d0   : > { %v949_v8 = vrot.slane %v942_v2, %v1630_v30 }
 0x2d2   : > { %v951_v9 = vadd.f32 %v949_v8, %v915_v7 }
 0x2d4   : > { %956 = vst.msk [vmem:[#allocation2] sm:$0x3] %vm1602_vm2, %v951_v9 }
 0x2db   : > { %v1054_v11 = vld [vmem:[#allocation2] sm:$0x3] }
 0x2dc   : > { %v1059_v12 = vrot.slane %v1054_v11, %v1642_v36  ;;  %v1063_v15 = vrot.slane %v1054_v11, %v1644_v0 }
 0x2de   : > { %v1067_v18 = vsel %vm1066_vm4, %v1059_v12, 0.0  ;;  %v1068_v30 = vsel %vm1066_vm4, %v1063_v15, 0.0 }
 0x2df   : > { %v1069_v19 = vadd.f32 %v1068_v30, %v1067_v18 }
 0x2e1   : > { %1070 = vadd.xlane.f32.xlu0 %v1069_v19 }
 0x2e5   : > { %1088 = vadd.xlane.f32.xlu0 %v1087_v21 }
 0x36a   : > { %v1071_v22 = vpop.xlane.xlu0 %1070 }
 0x36b   : > { %v1072_v23 = vmul.f32 0.0013020834, %v1071_v22 }
 0x36d   : > { %v1112_v0 = vrot.slane %v1072_v23, %v1642_v36 }
 0x36e   : > { %v1089_v24 = vpop.xlane.xlu0 %1088 }
 0x36f   : > { %1113 = vst [vmem:[%s442_s21] sm:$0xff] %v1112_v0  ;;  %v1090_v25 = vmul.f32 0.00012207031, %v1089_v24 }
 0x371   : > { %v1117_v26 = vrot.slane %v1090_v25, %v1642_v36 }
 0x373   : > { %1118 = vst [vmem:[%s446_s24] sm:$0xff] %v1117_v26 }
 0x374 PF: > { %s32_s27 = sadd.s32 1, %s1438_s27   ;;  %s1717_s1 = smov %s1434_s26 }
 0x375   : > { %p29_p1 = scmp.ge.s32.totalorder %s32_s27, 6   ;;  %s1718_s26 = smov %s1720_s28 }
 0x377   :  { %31 = sbr.rel (!%p29_p1) target bundleno = 27 (0x1b), region = 121 }

</bundles_post_ra>
